<compile_context>
chip_gen: v5e
topology: v5e:2x2
jax: 0.10.0
libtpu: 0.0.40
codegen_flags: <defaults>
</compile_context>

<pallas_src>
import functools

import jax
import jax.numpy as jnp
from jax.experimental import pallas as pl
from jax.experimental.pallas import tpu as pltpu


def _round_up(x, m):
    return (x + m - 1) // m * m


def soft_q_kernel(s_ref, a_ref, w1s_ref, w1a_ref, b1_ref,
                  w2_ref, b2_ref, w3_ref, b3_ref, o_ref, *, compute_dtype):
    c = pl.program_id(0)  # critic index (for the SMEM head bias)

    # Layer 1: fused "concat" — two MXU dots into the same f32 accumulator.
    s = s_ref[...].astype(compute_dtype)
    a = a_ref[...].astype(compute_dtype)
    h1 = jnp.dot(s, w1s_ref[0].astype(compute_dtype),
                 preferred_element_type=jnp.float32)
    h1 = h1 + jnp.dot(a, w1a_ref[0].astype(compute_dtype),
                      preferred_element_type=jnp.float32)
    h1 = jnp.maximum(h1 + b1_ref[0], 0.0)                       # f32 bias/ReLU

    # Layer 2: MXU matmul + bias + ReLU (bias/ReLU in f32).
    h2 = jnp.dot(h1.astype(compute_dtype), w2_ref[0].astype(compute_dtype),
                 preferred_element_type=jnp.float32)
    h2 = jnp.maximum(h2 + b2_ref[0], 0.0)

    # Layer 3: 1-unit head as VPU multiply + lane reduction (w3 is a (1, H)
    # row) — keeps the MXU free instead of an N=1 matmul. b3 is an SMEM scalar.
    q = jnp.sum(h2 * w3_ref[0], axis=-1, keepdims=True) + b3_ref[c]   # (TB, 1)

    # Lane-dense store: transpose (TB, 1) -> (1, TB) (XLU slot) so the
    # writeback is a dense row along the 128-lane axis.
    o_ref[0] = q.T.astype(o_ref.dtype)


def _choose_batch_tile(B, block_batch, num_critics):
    TB = max(1, min(block_batch, B))
    # v7x megacore: with a single critic make sure the "parallel" batch axis
    # has >= 2 steps so both TensorCores get work (costs one extra ~0.35us
    # grid step on single-TC v5e/v6e — negligible here).
    if num_critics == 1 and B >= 256:
        TB = min(TB, max(128, _round_up(pl.cdiv(B, 2), 128)))
    if TB >= B:
        return B, 1                       # single full-extent tile, no raggedness
    TB = _round_up(TB, 128)               # tiled: lane-aligned, unmasked stores
    if TB >= B:
        return B, 1
    return TB, pl.cdiv(B, TB)


def soft_q_forward_stacked(state, action, params, *, block_batch=512,
                           compute_dtype=jnp.float32):
    """Forward for C stacked critics sharing (state, action).

    params: (w1s, w1a, b1, w2, b2, w3, b3) with a leading critic axis C:
      w1s (C, num_inputs, H), w1a (C, num_actions, H), b1/b2/w3 (C, 1, H),
      w2 (C, H, H), b3 (C,).
    Returns q of shape (C, B, 1).
    """
    w1s, w1a, b1, w2, b2, w3, b3 = params
    C, num_inputs, H = w1s.shape
    num_actions = w1a.shape[1]
    B = state.shape[0]
    d_in = num_inputs + num_actions

    TB, num_tiles = _choose_batch_tile(B, block_batch, C)
    Bp = TB * num_tiles
    grid = (C, num_tiles)

    resident = lambda c, i: (c, 0, 0)     # weights/biases: per-critic, batch-resident
    batched = lambda c, i: (i, 0)         # activations: tile along batch

    flops = 2 * C * Bp * (d_in * H + H * H + H)
    bytes_accessed = 4 * (C * Bp * d_in                       # activations (per critic)
                          + C * (d_in * H + H * H + 3 * H + 1)  # weights/biases
                          + C * Bp)                           # q out

    # Scoped-VMEM budget: double-buffered activation tiles + double-buffered
    # resident weights (they revisit across the critic axis) + headroom for
    # h1/h2 intermediates the compiler may spill.
    vmem_est = (2 * 4 * (TB * d_in + TB + d_in * H + H * H + 3 * H)
                + 4 * 4 * TB * H)
    vmem_limit = int(min(max(int(vmem_est * 1.5), 32 * 2 ** 20), 110 * 2 ** 20))

    out = pl.pallas_call(
        functools.partial(soft_q_kernel, compute_dtype=compute_dtype),
        out_shape=jax.ShapeDtypeStruct((C, 1, Bp), jnp.float32),
        grid=grid,
        in_specs=[
            pl.BlockSpec((TB, num_inputs), batched),
            pl.BlockSpec((TB, num_actions), batched),
            pl.BlockSpec((1, num_inputs, H), resident),
            pl.BlockSpec((1, num_actions, H), resident),
            pl.BlockSpec((1, 1, H), resident),
            pl.BlockSpec((1, H, H), resident),
            pl.BlockSpec((1, 1, H), resident),
            pl.BlockSpec((1, 1, H), resident),
            pl.BlockSpec(memory_space=pltpu.MemorySpace.SMEM),   # b3: (C,) scalars
        ],
        out_specs=pl.BlockSpec((1, 1, TB), lambda c, i: (c, 0, i)),
        compiler_params=pltpu.CompilerParams(
            dimension_semantics=("parallel", "parallel"),
            vmem_limit_bytes=vmem_limit),
        cost_estimate=pl.CostEstimate(
            flops=flops, transcendentals=0, bytes_accessed=bytes_accessed),
    )(state, action, w1s, w1a, b1, w2, b2, w3, b3)

    q = out.reshape(C, Bp)
    if Bp != B:
        q = q[:, :B]          # drop ragged-tile rows (tiny: C*B floats)
    return q[..., None]        # (C, B, 1)


def stack_params(params_list):
    """Stack per-critic params along a leading critic axis (twin-critic fusion)."""
    w1s = jnp.stack([p[0] for p in params_list])
    w1a = jnp.stack([p[1] for p in params_list])
    b1 = jnp.stack([p[2] for p in params_list])
    w2 = jnp.stack([p[3] for p in params_list])
    b2 = jnp.stack([p[4] for p in params_list])
    w3 = jnp.stack([p[5] for p in params_list])
    b3 = jnp.stack([p[6].reshape(()) for p in params_list])   # (C,) — SMEM scalars
    return (w1s, w1a, b1, w2, b2, w3, b3)


def soft_q_forward(state, action, params, **kwargs):
    """Single-critic forward (matches the PyTorch SoftQNetwork): (B, 1) output."""
    return soft_q_forward_stacked(state, action, stack_params([params]), **kwargs)[0]


def soft_q_forward_twin(state, action, params_q1, params_q2, **kwargs):
    """SAC twin critics fused into one pallas_call; returns (q1, q2)."""
    q = soft_q_forward_stacked(state, action,
                               stack_params([params_q1, params_q2]), **kwargs)
    return q[0], q[1]


def init_params(key, num_inputs, num_actions, hidden_size, init_w=0.003):
    """Mimics PyTorch nn.Linear default init (uniform(+/- 1/sqrt(fan_in))) and
    the custom uniform(+/- init_w) for linear3. linear1's weight is drawn as a
    single (d_in, H) matrix (correct fan_in) then split into state/action
    halves; weights are stored (in, out); w3 stays as a (1, H) row."""
    k1, k2, k3, k4, k5, k6 = jax.random.split(key, 6)
    d_in = num_inputs + num_actions

    bnd1 = 1.0 / (d_in ** 0.5)
    w1 = jax.random.uniform(k1, (d_in, hidden_size), jnp.float32, -bnd1, bnd1)
    b1 = jax.random.uniform(k2, (1, hidden_size), jnp.float32, -bnd1, bnd1)
    w1s, w1a = w1[:num_inputs], w1[num_inputs:]

    bnd2 = 1.0 / (hidden_size ** 0.5)
    w2 = jax.random.uniform(k3, (hidden_size, hidden_size), jnp.float32, -bnd2, bnd2)
    b2 = jax.random.uniform(k4, (1, hidden_size), jnp.float32, -bnd2, bnd2)

    w3 = jax.random.uniform(k5, (1, hidden_size), jnp.float32, -init_w, init_w)
    b3 = jax.random.uniform(k6, (1, 1), jnp.float32, -init_w, init_w)

    return (w1s, w1a, b1, w2, b2, w3, b3)


if __name__ == "__main__":
    key = jax.random.PRNGKey(0)
    kp1, kp2, ks, ka = jax.random.split(key, 4)

    batch = 8
    num_inputs = 16
    num_actions = 8
    hidden_size = 32

    params1 = init_params(kp1, num_inputs, num_actions, hidden_size)
    params2 = init_params(kp2, num_inputs, num_actions, hidden_size)
    state = jax.random.normal(ks, (batch, num_inputs), jnp.float32)
    action = jax.random.normal(ka, (batch, num_actions), jnp.float32)

    # Pure-JAX reference of the original module's math (concat + 3 linears).
    def ref_forward(params):
        w1s, w1a, b1, w2, b2, w3, b3 = params
        x = jnp.concatenate([state, action], axis=1)
        w1 = jnp.concatenate([w1s, w1a], axis=0)
        h = jnp.maximum(x @ w1 + b1, 0.0)
        h = jnp.maximum(h @ w2 + b2, 0.0)
        return h @ w3.T + b3

    ref1 = ref_forward(params1)
    ref2 = ref_forward(params2)

    # 1) Single critic, f32 (exact module semantics).
    q1 = soft_q_forward(state, action, params1)
    jax.block_until_ready(q1)
    assert q1.shape == (batch, 1)
    assert jnp.allclose(q1, ref1, atol=1e-4), "f32 single-critic mismatch"

    # 2) Fused twin critics: one pallas_call emits Q1 and Q2.
    qa, qb = soft_q_forward_twin(state, action, params1, params2)
    jax.block_until_ready(qb)
    assert qa.shape == (batch, 1) and qb.shape == (batch, 1)
    assert jnp.allclose(qa, ref1, atol=1e-4), "twin critic Q1 mismatch"
    assert jnp.allclose(qb, ref2, atol=1e-4), "twin critic Q2 mismatch"

    # 3) bf16 MXU path (f32 accumulation / bias / ReLU / head): looser tolerance.
    q1_bf16 = soft_q_forward(state, action, params1, compute_dtype=jnp.bfloat16)
    jax.block_until_ready(q1_bf16)
    assert jnp.allclose(q1_bf16, ref1, atol=3e-2), "bf16 single-critic mismatch"

    print("KERNEL_OK")
</pallas_src>

<mosaic_0001>
module attributes {stable_mosaic.version = 11 : i64} {
  func.func @soft_q_kernel(%arg0: i32, %arg1: i32, %arg2: memref<8x16xf32, #tpu.memory_space<vmem>>, %arg3: memref<8x8xf32, #tpu.memory_space<vmem>>, %arg4: memref<1x16x32xf32, #tpu.memory_space<vmem>>, %arg5: memref<1x8x32xf32, #tpu.memory_space<vmem>>, %arg6: memref<1x1x32xf32, #tpu.memory_space<vmem>>, %arg7: memref<1x32x32xf32, #tpu.memory_space<vmem>>, %arg8: memref<1x1x32xf32, #tpu.memory_space<vmem>>, %arg9: memref<1x1x32xf32, #tpu.memory_space<vmem>>, %arg10: memref<1xf32, #tpu.memory_space<smem>>, %arg11: memref<1x1x8xf32, #tpu.memory_space<vmem>>) attributes {dimension_semantics = [#tpu.dimension_semantics<parallel>, #tpu.dimension_semantics<parallel>], iteration_bounds = array<i64: 1, 1>, scalar_prefetch = 0 : i64, scratch_operands = 0 : i64, tpu.core_type = #tpu.core_type<tc>, window_params = [{transform_indices = @transform_0, window_bounds = array<i64: 8, 16>}, {transform_indices = @transform_1, window_bounds = array<i64: 8, 8>}, {transform_indices = @transform_2, window_bounds = array<i64: 1, 16, 32>}, {transform_indices = @transform_3, window_bounds = array<i64: 1, 8, 32>}, {transform_indices = @transform_4, window_bounds = array<i64: 1, 1, 32>}, {transform_indices = @transform_5, window_bounds = array<i64: 1, 32, 32>}, {transform_indices = @transform_6, window_bounds = array<i64: 1, 1, 32>}, {transform_indices = @transform_7, window_bounds = array<i64: 1, 1, 32>}, {transform_indices = @transform_8, window_bounds = array<i64: 1>}, {transform_indices = @transform_9, window_bounds = array<i64: 1, 1, 8>}]} {
    %c0 = arith.constant 0 : index
    %c0_0 = arith.constant 0 : index
    %0 = vector.load %arg2[%c0, %c0_0] : memref<8x16xf32, #tpu.memory_space<vmem>>, vector<8x16xf32>
    %c0_1 = arith.constant 0 : index
    %c0_2 = arith.constant 0 : index
    %1 = vector.load %arg3[%c0_1, %c0_2] : memref<8x8xf32, #tpu.memory_space<vmem>>, vector<8x8xf32>
    %c0_3 = arith.constant 0 : index
    %c0_4 = arith.constant 0 : index
    %c0_5 = arith.constant 0 : index
    %2 = vector.load %arg4[%c0_3, %c0_4, %c0_5] : memref<1x16x32xf32, #tpu.memory_space<vmem>>, vector<1x16x32xf32>
    %3 = vector.shape_cast %2 : vector<1x16x32xf32> to vector<16x32xf32>
    %cst = arith.constant dense<0.000000e+00> : vector<8x32xf32>
    %4 = tpu.matmul %0, %3, %cst {dimension_numbers = #tpu.dot_dimension_numbers<[1], [0], [0], [1], [0, 0, 1, 1], [], []>} : vector<8x16xf32>, vector<16x32xf32>, vector<8x32xf32> -> vector<8x32xf32>
    %c0_6 = arith.constant 0 : index
    %c0_7 = arith.constant 0 : index
    %c0_8 = arith.constant 0 : index
    %5 = vector.load %arg5[%c0_6, %c0_7, %c0_8] : memref<1x8x32xf32, #tpu.memory_space<vmem>>, vector<1x8x32xf32>
    %6 = vector.shape_cast %5 : vector<1x8x32xf32> to vector<8x32xf32>
    %cst_9 = arith.constant dense<0.000000e+00> : vector<8x32xf32>
    %7 = tpu.matmul %1, %6, %cst_9 {dimension_numbers = #tpu.dot_dimension_numbers<[1], [0], [0], [1], [0, 0, 1, 1], [], []>} : vector<8x8xf32>, vector<8x32xf32>, vector<8x32xf32> -> vector<8x32xf32>
    %8 = arith.addf %4, %7 : vector<8x32xf32>
    %c0_10 = arith.constant 0 : index
    %c0_11 = arith.constant 0 : index
    %c0_12 = arith.constant 0 : index
    %9 = vector.load %arg6[%c0_10, %c0_11, %c0_12] : memref<1x1x32xf32, #tpu.memory_space<vmem>>, vector<1x1x32xf32>
    %10 = vector.shape_cast %9 : vector<1x1x32xf32> to vector<1x32xf32>
    %11 = vector.broadcast %10 : vector<1x32xf32> to vector<8x32xf32>
    %12 = arith.addf %8, %11 : vector<8x32xf32>
    %cst_13 = arith.constant 0.000000e+00 : f32
    %13 = vector.broadcast %cst_13 : f32 to vector<8x32xf32>
    %14 = arith.maximumf %12, %13 : vector<8x32xf32>
    %c0_14 = arith.constant 0 : index
    %c0_15 = arith.constant 0 : index
    %c0_16 = arith.constant 0 : index
    %15 = vector.load %arg7[%c0_14, %c0_15, %c0_16] : memref<1x32x32xf32, #tpu.memory_space<vmem>>, vector<1x32x32xf32>
    %16 = vector.shape_cast %15 : vector<1x32x32xf32> to vector<32x32xf32>
    %cst_17 = arith.constant dense<0.000000e+00> : vector<8x32xf32>
    %17 = tpu.matmul %14, %16, %cst_17 {dimension_numbers = #tpu.dot_dimension_numbers<[1], [0], [0], [1], [0, 0, 1, 1], [], []>} : vector<8x32xf32>, vector<32x32xf32>, vector<8x32xf32> -> vector<8x32xf32>
    %c0_18 = arith.constant 0 : index
    %c0_19 = arith.constant 0 : index
    %c0_20 = arith.constant 0 : index
    %18 = vector.load %arg8[%c0_18, %c0_19, %c0_20] : memref<1x1x32xf32, #tpu.memory_space<vmem>>, vector<1x1x32xf32>
    %19 = vector.shape_cast %18 : vector<1x1x32xf32> to vector<1x32xf32>
    %20 = vector.broadcast %19 : vector<1x32xf32> to vector<8x32xf32>
    %21 = arith.addf %17, %20 : vector<8x32xf32>
    %cst_21 = arith.constant 0.000000e+00 : f32
    %22 = vector.broadcast %cst_21 : f32 to vector<8x32xf32>
    %23 = arith.maximumf %21, %22 : vector<8x32xf32>
    %c0_22 = arith.constant 0 : index
    %c0_23 = arith.constant 0 : index
    %c0_24 = arith.constant 0 : index
    %24 = vector.load %arg9[%c0_22, %c0_23, %c0_24] : memref<1x1x32xf32, #tpu.memory_space<vmem>>, vector<1x1x32xf32>
    %25 = vector.shape_cast %24 : vector<1x1x32xf32> to vector<1x32xf32>
    %26 = vector.broadcast %25 : vector<1x32xf32> to vector<8x32xf32>
    %27 = arith.mulf %23, %26 : vector<8x32xf32>
    %cst_25 = arith.constant dense<0.000000e+00> : vector<8xf32>
    %28 = vector.multi_reduction <add>, %27, %cst_25 [1] : vector<8x32xf32> to vector<8xf32>
    %29 = vector.shape_cast %28 : vector<8xf32> to vector<8x1xf32>
    %30 = arith.index_cast %arg0 : i32 to index
    %31 = memref.load %arg10[%30] : memref<1xf32, #tpu.memory_space<smem>>
    %32 = vector.broadcast %31 : f32 to vector<8x1xf32>
    %33 = arith.addf %29, %32 : vector<8x1xf32>
    %34 = tpu.transpose %33, [1, 0] : vector<8x1xf32> -> vector<1x8xf32>
    %c0_26 = arith.constant 0 : index
    %c0_27 = arith.constant 0 : index
    %c0_28 = arith.constant 0 : index
    %35 = vector.load %arg11[%c0_26, %c0_27, %c0_28] : memref<1x1x8xf32, #tpu.memory_space<vmem>>, vector<1x1x8xf32>
    %36 = vector.shape_cast %35 : vector<1x1x8xf32> to vector<1x8xf32>
    %37 = vector.shape_cast %34 : vector<1x8xf32> to vector<1x1x8xf32>
    tpu.vector_store %arg11[%c0_26, %c0_27, %c0_28], %37 {strides = array<i32>} : memref<1x1x8xf32, #tpu.memory_space<vmem>>, vector<1x1x8xf32>,
    return
  }
  func.func @transform_0(%arg0: i32, %arg1: i32) -> (i32, i32) {
    %c0_i32 = arith.constant 0 : i32
    %c0_i32_0 = arith.constant 0 : i32
    return %arg1, %c0_i32 : i32, i32
  }
  func.func @transform_1(%arg0: i32, %arg1: i32) -> (i32, i32) {
    %c0_i32 = arith.constant 0 : i32
    %c0_i32_0 = arith.constant 0 : i32
    return %arg1, %c0_i32 : i32, i32
  }
  func.func @transform_2(%arg0: i32, %arg1: i32) -> (i32, i32, i32) {
    %c0_i32 = arith.constant 0 : i32
    %c0_i32_0 = arith.constant 0 : i32
    %c0_i32_1 = arith.constant 0 : i32
    return %arg0, %c0_i32, %c0_i32_0 : i32, i32, i32
  }
  func.func @transform_3(%arg0: i32, %arg1: i32) -> (i32, i32, i32) {
    %c0_i32 = arith.constant 0 : i32
    %c0_i32_0 = arith.constant 0 : i32
    %c0_i32_1 = arith.constant 0 : i32
    return %arg0, %c0_i32, %c0_i32_0 : i32, i32, i32
  }
  func.func @transform_4(%arg0: i32, %arg1: i32) -> (i32, i32, i32) {
    %c0_i32 = arith.constant 0 : i32
    %c0_i32_0 = arith.constant 0 : i32
    %c0_i32_1 = arith.constant 0 : i32
    return %arg0, %c0_i32, %c0_i32_0 : i32, i32, i32
  }
  func.func @transform_5(%arg0: i32, %arg1: i32) -> (i32, i32, i32) {
    %c0_i32 = arith.constant 0 : i32
    %c0_i32_0 = arith.constant 0 : i32
    %c0_i32_1 = arith.constant 0 : i32
    return %arg0, %c0_i32, %c0_i32_0 : i32, i32, i32
  }
  func.func @transform_6(%arg0: i32, %arg1: i32) -> (i32, i32, i32) {
    %c0_i32 = arith.constant 0 : i32
    %c0_i32_0 = arith.constant 0 : i32
    %c0_i32_1 = arith.constant 0 : i32
    return %arg0, %c0_i32, %c0_i32_0 : i32, i32, i32
  }
  func.func @transform_7(%arg0: i32, %arg1: i32) -> (i32, i32, i32) {
    %c0_i32 = arith.constant 0 : i32
    %c0_i32_0 = arith.constant 0 : i32
    %c0_i32_1 = arith.constant 0 : i32
    return %arg0, %c0_i32, %c0_i32_0 : i32, i32, i32
  }
  func.func @transform_8(%arg0: i32, %arg1: i32) -> i32 {
    %c0_i32 = arith.constant 0 : i32
    %c0_i32_0 = arith.constant 0 : i32
    return %c0_i32 : i32
  }
  func.func @transform_9(%arg0: i32, %arg1: i32) -> (i32, i32, i32) {
    %c0_i32 = arith.constant 0 : i32
    %c0_i32_0 = arith.constant 0 : i32
    return %arg0, %c0_i32, %arg1 : i32, i32, i32
  }
}

</mosaic_0001>

<bundles_post_ra>
// kernel: tpu_custom_call.1
= control target key start
LH: loop header
LB: loop body
LE: loop exit
PB: predicated region body
PF: predicated region fallthrough
CT: control target
= control target key end

     0   :  { %15 = vsyncpa [#allocation4], 0  ;;  %s517_s0 = inlined_call_operand.hbm [shape: f32[8,16], index: 0, kind: input, shape index: {}]   ;;  %s518_s1 = inlined_call_operand.hbm [shape: f32[8,8], index: 1, kind: input, shape index: {}]   ;;  %s519_s2 = inlined_call_operand.hbm [shape: f32[1,16,32], index: 2, kind: input, shape index: {}]   ;;  %s520_s3 = inlined_call_operand.hbm [shape: f32[1,8,32], index: 3, kind: input, shape index: {}]   ;;  %s521_s4 = inlined_call_operand.vmem [shape: f32[1,1,32], index: 4, kind: input, shape index: {}]   ;;  %s522_s5 = inlined_call_operand.hbm [shape: f32[1,32,32], index: 5, kind: input, shape index: {}]   ;;  %s523_s6 = inlined_call_operand.vmem [shape: f32[1,1,32], index: 6, kind: input, shape index: {}]   ;;  %s524_s7 = inlined_call_operand.vmem [shape: f32[1,1,32], index: 7, kind: input, shape index: {}]   ;;  %s525_s8 = inlined_call_operand.<no memory space> [shape: f32[1], index: 8, kind: input, shape index: {}]   ;;  %s526_s9 = inlined_call_operand.hbm [shape: f32[1,1,8], index: 9, kind: output, shape index: {}]  }
   0x1   :  { %16 = vsyncpa [#allocation7], 0 }
   0x2   :  { %17 = vsyncpa [#allocation10], 0  ;;  %s35_s11 = sshll.u32 %s518_s1, 4  ;;  %s36_s11 = int_to_ptr.hbm [resolvable:$true] %s35_s11 }
   0x3   :  { %18 = vsyncpa [#allocation5], 0  ;;  %s429_s12 = smov [#allocation6]   ;;  %s59_s16 = sshll.u32 %s520_s3, 4  ;;  %s60_s16 = int_to_ptr.hbm [resolvable:$true] %s59_s16 }
   0x4   :  { %s37_s13 = sshll.u32 %s429_s12, 4  ;;  %s430_s17 = smov [#allocation9]   ;;  %s38_s13 = int_to_ptr.vmem [resolvable:$true] %s37_s13 }
   0x5   :  { %40 = dma.hbm_to_vmem [thread:$0]  %s36_s11, 128, %s38_s13, [#allocation7]  }
   0x6   :  { %s61_s18 = sshll.u32 %s430_s17, 4  ;;  %s24_s21 = sshll.u32 %s517_s0, 4  ;;  %s62_s18 = int_to_ptr.vmem [resolvable:$true] %s61_s18  ;;  %s25_s21 = int_to_ptr.hbm [resolvable:$true] %s24_s21 }
   0x7   :  { %64 = dma.hbm_to_vmem [thread:$0]  %s60_s16, 128, %s62_s18, [#allocation10]  }
   0x8   :  { %s45_s23 = sshll.u32 %s519_s2, 4  ;;  %s431_s24 = smov [#allocation3]   ;;  %s46_s23 = int_to_ptr.hbm [resolvable:$true] %s45_s23 }
   0x9   :  { %s26_s25 = sshll.u32 %s431_s24, 4  ;;  %s432_s3 = smov [#allocation8]   ;;  %s27_s25 = int_to_ptr.vmem [resolvable:$true] %s26_s25 }
   0xa   :  { %29 = dma.hbm_to_vmem [thread:$0]  %s25_s21, 128, %s27_s25, [#allocation4]  }
   0xb   :  { %s47_s26 = sshll.u32 %s432_s3, 4  ;;  %s433_s27 = smov 128   ;;  %s48_s26 = int_to_ptr.vmem [resolvable:$true] %s47_s26 }
   0xc   :  { %s434_s28 = smov 8   ;;  %s71_s30 = sshll.u32 %s522_s5, 4  ;;  %s72_s30 = int_to_ptr.hbm [resolvable:$true] %s71_s30 }
   0xd   :  { %53 = dma.hbm_to_vmem [thread:$0]  %s46_s23, 256, %s48_s26, [#allocation7], %s433_s27, %s433_s27, %s434_s28  }
   0xe   :  { %s435_s10 = smov [#allocation11]  }
   0xf   :  { %s73_s11 = sshll.u32 %s435_s10, 4  ;;  %s74_s11 = int_to_ptr.vmem [resolvable:$true] %s73_s11 }
  0x10   :  { %79 = dma.hbm_to_vmem [thread:$0]  %s72_s30, 512, %s74_s11, [#allocation10], %s433_s27, %s433_s27, %s434_s28  }
  0x11   :  { %421 = dma.done.wait [#allocation4], 128  }
  0x12   :  { %422 = vsyncadd [#allocation4], 4294967168 }
  0x13   :  { %423 = dma.done.wait [#allocation7], 384  }
  0x14   :  { %424 = vsyncadd [#allocation7], 4294966912 }
  0x15   :  { %425 = dma.done.wait [#allocation10], 640  }
  0x16   :  { %426 = vsyncadd [#allocation10], 4294966656  ;;  %vm111_vm0 = vcmask 64512   ;;  %v109_v0 = vld [vmem:[#allocation8 + $0x8] sm:$0xff]  ;;  %v110_v1 = vld [vmem:[#allocation9] sm:$0xff]  ;;  %vm135_vm1 = vcmask 130048   ;;  %v207_v22 = vstv %s525_s8 }
  0x17   :  { %v108_v2 = vld [vmem:[#allocation8] sm:$0xff]  ;;  %153 = vmatpush.msra.mxu1 %v109_v0  ;;  %130 = vmatpush.msra.mxu0 %v110_v1  ;;  %v107_v3 = vld [vmem:[#allocation6] sm:$0xff]  ;;  %v106_v4 = vld [vmem:[#allocation3] sm:$0xff]  ;;  %vm173_vm2 = vcmask 261120   ;;  %s436_s17 = smov [#allocation12]   ;;  %s250_s20 = sshll.u32 %s526_s9, 4  ;;  %s251_s20 = int_to_ptr.hbm [resolvable:$true] %s250_s20 }
  0x18   :  { %262 = vmatmul.msk.f32.vlgmr.msra.gmra.mxu0 %vm111_vm0, %v107_v3  ;;  %v168_v5 = vld [vmem:[#allocation11 + $0x18] sm:$0xff]  ;;  %v167_v6 = vld [vmem:[#allocation11 + $0x10] sm:$0xff]  ;;  %v166_v7 = vld [vmem:[#allocation11 + $0x8] sm:$0xff]  ;;  %s248_s18 = sshll.u32 %s436_s17, 4  ;;  %vm241_vm3 = vcmask 57344   ;;  %s249_s18 = int_to_ptr.vmem [resolvable:$true] %s248_s18 }
  0x19   :  { %154 = vmatpush.msra.mxu1 %v108_v2  ;;  %189 = vmatpush.msra.mxu2 %v168_v5  ;;  %v165_v8 = vld [vmem:[#allocation11] sm:$0xff]  ;;  %v274_v10 = vld [vmem:[%s521_s4] ss:$0 sm:$0xff] }
  0x1a   :  { %263 = vmatmul.msk.f32.vlgmr.msra.gmra.mxu1 %vm135_vm1, %v106_v4  ;;  %v275_v15 = vld [vmem:[%s523_s6] ss:$0 sm:$0xff] }
  0x1b   :  { %190 = vmatpush.msra.mxu2 %v167_v6  ;;  %v276_v18 = vld [vmem:[%s524_s7] ss:$0 sm:$0xff] }
  0x1d   :  { %191 = vmatpush.msra.mxu2 %v166_v7 }
  0x1f   :  { %192 = vmatpush.msra.mxu2 %v165_v8 }
  0x95   :  { %v132_v9 = vpop.f32.mrf.mxu0 }
  0x97   :  { %v156_v11 = vpop.f32.mrf.mxu1 }
  0x98   :  { %v157_v12 = vadd.f32 %v156_v11, %v132_v9 }
  0x9a   :  { %v163_v13 = vadd.f32 %v274_v10, %v157_v12 }
  0x9c   :  { %v164_v14 = vmax.f32 %v163_v13, 0.0 }
  0x9e   :  { %264 = vmatmul.msk.f32.vlgmr.msra.gmra.mxu2 %vm173_vm2, %v164_v14 }
 0x121   :  { %v194_v16 = vpop.f32.mrf.mxu2 }
 0x122   :  { %v195_v17 = vadd.f32 %v275_v15, %v194_v16 }
 0x124   :  { %v197_v19 = vmax.f32 %v195_v17, 0.0 }
 0x126   :  { %v202_v20 = vmul.f32 %v276_v18, %v197_v19 }
 0x128   :  { %v203_v21 = vsel %vm173_vm2, %v202_v20, 0.0 }
 0x129   :  { %204 = vadd.xlane.f32.xlu0 %v203_v21 }
 0x19c   :  { %v205_v23 = vpop.xlane.xlu0 %204 }
 0x19d   :  { %v208_v24 = vadd.f32 %v207_v22, %v205_v23 }
 0x19f   :  { %209 = vxpose.xlu0.b32.start.end [1/1] (short) (narrow) %v208_v24, 8 }
 0x243   :  { %v225_v25 = vpop.trf.xlu0 }
 0x244   :  { %242 = vst.msk [vmem:[#allocation12] sm:$0x1] %vm241_vm3, %v225_v25 }
 0x245   :  { %253 = dma.vmem_to_hbm [thread:$0]  %s249_s18, 16, %s251_s20, [#allocation5]  }
 0x246   :  { %427 = dma.done.wait [#allocation5], 16  }
 0x247   :  { %428 = vsyncadd [#allocation5], 4294967280 }
 0x248   :  { %258 = vsyncpa [#allocation4], 1 }
 0x249   :  { %259 = vsyncpa [#allocation7], 1 }
 0x24a   :  { %260 = vsyncpa [#allocation10], 1 }
 0x24b   :  { %261 = vsyncpa [#allocation5], 1 }

</bundles_post_ra>
